<compile_context>
chip_gen: v5e
topology: v5e:2x2
jax: 0.10.0
libtpu: 0.0.40
codegen_flags: <defaults>
</compile_context>

<pallas_src>
import functools

import jax
import jax.numpy as jnp
from jax.experimental import pallas as pl
from jax.experimental.pallas import tpu as pltpu

EPS = 1e-5                      # BatchNorm2d default eps
LANE = 128                      # vreg lane width
VMEM_LIMIT_BYTES = 32 * 1024 * 1024   # explicit scoped-VMEM budget, safe on v5e/v6e/v7x


def _round_up(x, m):
    return (x + m - 1) // m * m


def _pick_tile_m(m, row_bytes, sublane, budget_bytes=8 << 20, max_tile=2048):
    """Largest M-tile that (a) is a multiple of the sublane packing, (b) divides M
    exactly (BatchNorm stats must cover exactly M rows), and (c) fits the VMEM
    budget double-buffered.  Then halved (while still legal) until the grid has
    >= 2 steps so both TensorCores get work on v7x megacore."""
    best = m                              # full extent is always a legal block
    t = sublane
    while t <= min(m, max_tile):
        if m % t == 0 and 2 * t * row_bytes <= budget_bytes:
            best = t
        t += sublane
    while (best > sublane and m // best < 2
           and (best // 2) % sublane == 0 and m % (best // 2) == 0):
        best //= 2
    return best


# ----------------------------------------------------------------------------
# 1x1 conv + BatchNorm(batch stats) + ReLU  — two tiled passes
# ----------------------------------------------------------------------------
def _pw_stats_kernel(x_ref, w_ref, sum_ref, sq_ref, *, compute_dtype):
    @pl.when(pl.program_id(0) == 0)
    def _init():
        sum_ref[...] = jnp.zeros_like(sum_ref)
        sq_ref[...] = jnp.zeros_like(sq_ref)

    x = x_ref[...].astype(compute_dtype)                   # [tm, Cin]
    w = w_ref[...].astype(compute_dtype)                   # [Cin, Cout]
    y = jnp.dot(x, w, preferred_element_type=jnp.float32)  # f32 accumulation
    sum_ref[...] += jnp.sum(y, axis=0, keepdims=True)
    sq_ref[...] += jnp.sum(y * y, axis=0, keepdims=True)


def _pw_apply_kernel(x_ref, w_ref, sum_ref, sq_ref, g_ref, b_ref, o_ref, *,
                     m_total, compute_dtype):
    x = x_ref[...].astype(compute_dtype)
    w = w_ref[...].astype(compute_dtype)
    y = jnp.dot(x, w, preferred_element_type=jnp.float32)  # [tm, Cout] f32
    inv_m = 1.0 / float(m_total)
    mean = sum_ref[...] * inv_m
    var = jnp.maximum(sq_ref[...] * inv_m - mean * mean, 0.0)
    scale = g_ref[...] * jax.lax.rsqrt(var + EPS)
    shift = b_ref[...] - mean * scale
    o_ref[...] = jnp.maximum(y * scale + shift, 0.0).astype(o_ref.dtype)


def pw_bn_relu(x_flat, w, gamma, beta, *, compute_dtype, out_dtype):
    m, c_in = x_flat.shape
    c_out = w.shape[1]

    min_itemsize = min(jnp.dtype(x_flat.dtype).itemsize, jnp.dtype(out_dtype).itemsize)
    sublane = 8 * (4 // min_itemsize)                      # 8 for f32, 16 for bf16
    row_bytes = (c_in + c_out) * 4
    tm = _pick_tile_m(m, row_bytes, sublane)
    grid = (m // tm,)

    x_spec = pl.BlockSpec((tm, c_in), lambda i: (i, 0))
    w_spec = pl.BlockSpec((c_in, c_out), lambda i: (0, 0))
    vec_spec = pl.BlockSpec((1, c_out), lambda i: (0, 0))

    # pass 1: global per-channel sum / sum-of-squares (resident accumulators)
    s, sq = pl.pallas_call(
        functools.partial(_pw_stats_kernel, compute_dtype=compute_dtype),
        grid=grid,
        in_specs=[x_spec, w_spec],
        out_specs=(vec_spec, vec_spec),
        out_shape=(jax.ShapeDtypeStruct((1, c_out), jnp.float32),
                   jax.ShapeDtypeStruct((1, c_out), jnp.float32)),
        compiler_params=pltpu.CompilerParams(
            dimension_semantics=("arbitrary",),
            vmem_limit_bytes=VMEM_LIMIT_BYTES),
        cost_estimate=pl.CostEstimate(
            flops=2 * m * c_in * c_out + 3 * m * c_out,
            transcendentals=0,
            bytes_accessed=4 * (m * c_in + c_in * c_out + 2 * c_out)),
    )(x_flat, w)

    # pass 2: recompute matmul per tile, normalize + affine + ReLU
    out = pl.pallas_call(
        functools.partial(_pw_apply_kernel, m_total=m, compute_dtype=compute_dtype),
        grid=grid,
        in_specs=[x_spec, w_spec, vec_spec, vec_spec, vec_spec, vec_spec],
        out_specs=pl.BlockSpec((tm, c_out), lambda i: (i, 0)),
        out_shape=jax.ShapeDtypeStruct((m, c_out), out_dtype),
        compiler_params=pltpu.CompilerParams(
            dimension_semantics=("parallel",),
            vmem_limit_bytes=VMEM_LIMIT_BYTES),
        cost_estimate=pl.CostEstimate(
            flops=2 * m * c_in * c_out + 4 * m * c_out,
            transcendentals=c_out,
            bytes_accessed=(4 * (m * c_in + c_in * c_out + 4 * c_out)
                            + m * c_out * jnp.dtype(out_dtype).itemsize)),
    )(x_flat, w, s, sq, gamma, beta)
    return out


# ----------------------------------------------------------------------------
# Depthwise KxK conv (groups == channels), halo built in VMEM scratch
# ----------------------------------------------------------------------------
def _dw_kernel(x_ref, wd_ref, o_ref, pad_ref, *, K, H, W):
    # x_ref: [1, H, W, C]; wd_ref: [K*K, C]; pad_ref: [1, H+K-1, W+K-1, C] scratch
    p = (K - 1) // 2
    pad_ref[...] = jnp.zeros_like(pad_ref)                 # zero halo, in VMEM only
    pad_ref[:, p:p + H, p:p + W, :] = x_ref[...].astype(jnp.float32)
    acc = jnp.zeros(o_ref.shape, jnp.float32)
    for t in range(K * K):                                 # static unrolled tap loop
        dh, dw = t // K, t % K
        acc = acc + pad_ref[:, dh:dh + H, dw:dw + W, :] * wd_ref[t, :]
    o_ref[...] = acc.astype(o_ref.dtype)
    # TODO(synk): bf16 taps (f32 acc) on v6e/v7x and H-tiling with halo DMA for
    # large spatial sizes; fuse the tap-sum into the following pointwise pass.


def depthwise_conv(x_nhwc, wd_flat, K):
    n, h, w, c = x_nhwc.shape
    p = (K - 1) // 2
    return pl.pallas_call(
        functools.partial(_dw_kernel, K=K, H=h, W=w),
        grid=(n,),
        in_specs=[pl.BlockSpec((1, h, w, c), lambda i: (i, 0, 0, 0)),
                  pl.BlockSpec((K * K, c), lambda i: (0, 0))],
        out_specs=pl.BlockSpec((1, h, w, c), lambda i: (i, 0, 0, 0)),
        out_shape=jax.ShapeDtypeStruct((n, h, w, c), jnp.float32),
        scratch_shapes=[pltpu.VMEM((1, h + 2 * p, w + 2 * p, c), jnp.float32)],
        compiler_params=pltpu.CompilerParams(
            dimension_semantics=("parallel",),
            vmem_limit_bytes=VMEM_LIMIT_BYTES),
    )(x_nhwc, wd_flat)


# ----------------------------------------------------------------------------
# ConvBranch forward (PyTorch semantics: NCHW in / NCHW out)
# ----------------------------------------------------------------------------
def conv_branch_forward(x_nchw, params, kernel, separable,
                        compute_dtype=jnp.float32):
    x = jnp.transpose(x_nchw, (0, 2, 3, 1)).astype(jnp.float32)   # NCHW -> NHWC
    # TODO(synk): fold this NCHW->NHWC transpose into the first kernel's
    # index_map / in-kernel transpose to save one HBM round trip.
    n, h, w, c_in = x.shape
    c_out = params["w1"].shape[1]
    c_pad = _round_up(c_out, LANE)        # lane-dense channel padding (no-op if already multiple of 128)

    act_dtype = jnp.bfloat16 if compute_dtype == jnp.bfloat16 else jnp.float32

    def pad_cols(a):                      # [r, c_out] -> [r, c_pad] with zeros
        return jnp.pad(a, ((0, 0), (0, c_pad - c_out)))

    # padded output channels get gamma=1 / beta=0 => stay exactly zero end-to-end
    w1 = pad_cols(params["w1"])                                   # [c_in,  c_pad]
    g1 = jnp.pad(params["g1"], ((0, 0), (0, c_pad - c_out)), constant_values=1.0)
    b1 = pad_cols(params["b1"])
    w2 = jnp.pad(params["w2"],
                 ((0, c_pad - params["w2"].shape[0]), (0, c_pad - c_out)))
    g2 = jnp.pad(params["g2"], ((0, 0), (0, c_pad - c_out)), constant_values=1.0)
    b2 = pad_cols(params["b2"])
    wd = pad_cols(params["wd"])                                   # [K*K, c_pad]

    x_flat = x.reshape(n * h * w, c_in)

    # conv1: 1x1 conv + BN + ReLU (two-pass, tiled over M)
    y = pw_bn_relu(x_flat, w1, g1, b1,
                   compute_dtype=compute_dtype, out_dtype=act_dtype)   # [M, c_pad]

    if separable:
        yd = depthwise_conv(y.reshape(n, h, w, c_pad), wd, kernel)     # f32 [N,H,W,c_pad]
        y = pw_bn_relu(yd.reshape(n * h * w, c_pad), w2, g2, b2,
                       compute_dtype=compute_dtype, out_dtype=jnp.float32)
    else:
        y = pw_bn_relu(y, w2, g2, b2,
                       compute_dtype=compute_dtype, out_dtype=jnp.float32)

    out = y.reshape(n, h, w, c_pad)[..., :c_out]
    return jnp.transpose(out, (0, 3, 1, 2))                            # NHWC -> NCHW


# ----------------------------------------------------------------------------
# Pure-JAX reference for validation
# ----------------------------------------------------------------------------
def _ref_pw_bn_relu(xf, w, g, b):
    y = xf @ w
    mean = y.mean(0, keepdims=True)
    var = ((y - mean) ** 2).mean(0, keepdims=True)
    return jnp.maximum((y - mean) * jax.lax.rsqrt(var + EPS) * g + b, 0.0)


def ref_forward(x_nchw, params, kernel, separable):
    x = jnp.transpose(x_nchw, (0, 2, 3, 1)).astype(jnp.float32)
    n, h, w, c_in = x.shape
    y = _ref_pw_bn_relu(x.reshape(-1, c_in), params["w1"], params["g1"], params["b1"])
    c_mid = y.shape[1]
    if separable:
        y_nhwc = y.reshape(n, h, w, c_mid)
        rhs = params["wd"].reshape(kernel, kernel, 1, c_mid)          # HWIO depthwise
        yd = jax.lax.conv_general_dilated(
            y_nhwc, rhs, window_strides=(1, 1),
            padding=[((kernel - 1) // 2,) * 2] * 2,
            dimension_numbers=("NHWC", "HWIO", "NHWC"),
            feature_group_count=c_mid)
        y = _ref_pw_bn_relu(yd.reshape(-1, c_mid), params["w2"], params["g2"], params["b2"])
    else:
        y = _ref_pw_bn_relu(y, params["w2"], params["g2"], params["b2"])
    out = y.reshape(n, h, w, -1)
    return jnp.transpose(out, (0, 3, 1, 2))


# ----------------------------------------------------------------------------
# Deterministic parameter init (shapes follow ConvBranch.__init__)
# ----------------------------------------------------------------------------
def init_params(key, in_filters, out_filters, kernel):
    assert in_filters == out_filters, "ENAS ConvBranch requires in_filters == out_filters"
    k1, k2, k3, k4, k5 = jax.random.split(key, 5)
    return {
        # conv1: Conv2d(in, out, 1) weight [out,in,1,1] -> stored as [in, out]
        "w1": jax.random.normal(k1, (in_filters, out_filters), jnp.float32) * 0.3,
        "g1": jax.random.normal(k2, (1, out_filters), jnp.float32) * 0.1 + 1.0,
        "b1": jax.random.normal(k3, (1, out_filters), jnp.float32) * 0.1,
        # depthwise Conv2d(in, in, K, groups=in) weight [in,1,K,K] -> [K*K, in]
        "wd": jax.random.normal(k4, (kernel * kernel, in_filters), jnp.float32) * 0.2,
        # pointwise Conv2d(in, out, 1) weight -> [in, out]
        "w2": jax.random.normal(k5, (in_filters, out_filters), jnp.float32) * 0.3,
        "g2": jnp.full((1, out_filters), 1.05, jnp.float32),
        "b2": jnp.full((1, out_filters), -0.02, jnp.float32),
    }


if __name__ == "__main__":
    N, C, H, W = 2, 8, 16, 16
    K = 3
    key = jax.random.PRNGKey(0)
    kx, kp = jax.random.split(key)
    x = jax.random.normal(kx, (N, C, H, W), jnp.float32)              # NCHW like PyTorch
    params = init_params(kp, in_filters=C, out_filters=C, kernel=K)

    for separable in (True, False):
        ref = jax.block_until_ready(ref_forward(x, params, K, separable))

        # f32 path: tight check against the pure-JAX reference
        out = jax.block_until_ready(
            conv_branch_forward(x, params, K, separable, compute_dtype=jnp.float32))
        assert out.shape == (N, C, H, W)
        assert jnp.allclose(out, ref, rtol=1e-4, atol=2e-4), (
            f"f32 mismatch (separable={separable}): "
            f"{float(jnp.max(jnp.abs(out - ref)))}")

        # bf16 MXU-operand path (f32 accumulation): loose check
        out_bf = jax.block_until_ready(
            conv_branch_forward(x, params, K, separable, compute_dtype=jnp.bfloat16))
        assert out_bf.shape == (N, C, H, W)
        assert jnp.allclose(out_bf, ref, rtol=2.5e-1, atol=2.5e-1), (
            f"bf16 mismatch (separable={separable}): "
            f"{float(jnp.max(jnp.abs(out_bf - ref)))}")

    print("KERNEL_OK")
</pallas_src>

<mosaic_0001>
module attributes {stable_mosaic.version = 11 : i64} {
  func.func @_pw_stats_kernel(%arg0: i32, %arg1: memref<256x8xf32, #tpu.memory_space<vmem>>, %arg2: memref<8x128xf32, #tpu.memory_space<vmem>>, %arg3: memref<1x128xf32, #tpu.memory_space<vmem>>, %arg4: memref<1x128xf32, #tpu.memory_space<vmem>>) attributes {dimension_semantics = [#tpu.dimension_semantics<arbitrary>], iteration_bounds = array<i64: 2>, scalar_prefetch = 0 : i64, scratch_operands = 0 : i64, tpu.core_type = #tpu.core_type<tc>, window_params = [{transform_indices = @transform_0, window_bounds = array<i64: 256, 8>}, {pipeline_mode = #tpu.pipeline_mode<synchronous>, transform_indices = @transform_1, window_bounds = array<i64: 8, 128>}, {pipeline_mode = #tpu.pipeline_mode<synchronous>, transform_indices = @transform_2, window_bounds = array<i64: 1, 128>}, {pipeline_mode = #tpu.pipeline_mode<synchronous>, transform_indices = @transform_3, window_bounds = array<i64: 1, 128>}]} {
    %c0_i32 = arith.constant 0 : i32
    %0 = arith.cmpi eq, %arg0, %c0_i32 : i32
    %1 = arith.extui %0 : i1 to i32
    %c0_i32_0 = arith.constant 0 : i32
    %2 = arith.cmpi ne, %1, %c0_i32_0 : i32
    scf.if %2 {
      %cst_14 = arith.constant 0.000000e+00 : f32
      %17 = vector.broadcast %cst_14 : f32 to vector<1x128xf32>
      %c0_15 = arith.constant 0 : index
      %c0_16 = arith.constant 0 : index
      %18 = vector.load %arg3[%c0_15, %c0_16] : memref<1x128xf32, #tpu.memory_space<vmem>>, vector<1x128xf32>
      tpu.vector_store %arg3[%c0_15, %c0_16], %17 {strides = array<i32>} : memref<1x128xf32, #tpu.memory_space<vmem>>, vector<1x128xf32>,
      %cst_17 = arith.constant 0.000000e+00 : f32
      %19 = vector.broadcast %cst_17 : f32 to vector<1x128xf32>
      %c0_18 = arith.constant 0 : index
      %c0_19 = arith.constant 0 : index
      %20 = vector.load %arg4[%c0_18, %c0_19] : memref<1x128xf32, #tpu.memory_space<vmem>>, vector<1x128xf32>
      tpu.vector_store %arg4[%c0_18, %c0_19], %19 {strides = array<i32>} : memref<1x128xf32, #tpu.memory_space<vmem>>, vector<1x128xf32>,
    } else {
    }
    %c0 = arith.constant 0 : index
    %c0_1 = arith.constant 0 : index
    %3 = vector.load %arg1[%c0, %c0_1] : memref<256x8xf32, #tpu.memory_space<vmem>>, vector<256x8xf32>
    %c0_2 = arith.constant 0 : index
    %c0_3 = arith.constant 0 : index
    %4 = vector.load %arg2[%c0_2, %c0_3] : memref<8x128xf32, #tpu.memory_space<vmem>>, vector<8x128xf32>
    %cst = arith.constant dense<0.000000e+00> : vector<256x128xf32>
    %5 = tpu.matmul %3, %4, %cst {dimension_numbers = #tpu.dot_dimension_numbers<[1], [0], [0], [1], [0, 0, 1, 1], [], []>} : vector<256x8xf32>, vector<8x128xf32>, vector<256x128xf32> -> vector<256x128xf32>
    %c0_4 = arith.constant 0 : index
    %c0_5 = arith.constant 0 : index
    %6 = vector.load %arg3[%c0_4, %c0_5] : memref<1x128xf32, #tpu.memory_space<vmem>>, vector<1x128xf32>
    %cst_6 = arith.constant dense<0.000000e+00> : vector<128xf32>
    %7 = vector.multi_reduction <add>, %5, %cst_6 [0] : vector<256x128xf32> to vector<128xf32>
    %8 = vector.shape_cast %7 : vector<128xf32> to vector<1x128xf32>
    %9 = arith.addf %6, %8 : vector<1x128xf32>
    %c0_7 = arith.constant 0 : index
    %c0_8 = arith.constant 0 : index
    %10 = vector.load %arg3[%c0_7, %c0_8] : memref<1x128xf32, #tpu.memory_space<vmem>>, vector<1x128xf32>
    tpu.vector_store %arg3[%c0_7, %c0_8], %9 {strides = array<i32>} : memref<1x128xf32, #tpu.memory_space<vmem>>, vector<1x128xf32>,
    %c0_9 = arith.constant 0 : index
    %c0_10 = arith.constant 0 : index
    %11 = vector.load %arg4[%c0_9, %c0_10] : memref<1x128xf32, #tpu.memory_space<vmem>>, vector<1x128xf32>
    %12 = arith.mulf %5, %5 : vector<256x128xf32>
    %cst_11 = arith.constant dense<0.000000e+00> : vector<128xf32>
    %13 = vector.multi_reduction <add>, %12, %cst_11 [0] : vector<256x128xf32> to vector<128xf32>
    %14 = vector.shape_cast %13 : vector<128xf32> to vector<1x128xf32>
    %15 = arith.addf %11, %14 : vector<1x128xf32>
    %c0_12 = arith.constant 0 : index
    %c0_13 = arith.constant 0 : index
    %16 = vector.load %arg4[%c0_12, %c0_13] : memref<1x128xf32, #tpu.memory_space<vmem>>, vector<1x128xf32>
    tpu.vector_store %arg4[%c0_12, %c0_13], %15 {strides = array<i32>} : memref<1x128xf32, #tpu.memory_space<vmem>>, vector<1x128xf32>,
    return
  }
  func.func @transform_0(%arg0: i32) -> (i32, i32) {
    %c0_i32 = arith.constant 0 : i32
    %c0_i32_0 = arith.constant 0 : i32
    return %arg0, %c0_i32 : i32, i32
  }
  func.func @transform_1(%arg0: i32) -> (i32, i32) {
    %c0_i32 = arith.constant 0 : i32
    %c0_i32_0 = arith.constant 0 : i32
    %c0_i32_1 = arith.constant 0 : i32
    return %c0_i32, %c0_i32_0 : i32, i32
  }
  func.func @transform_2(%arg0: i32) -> (i32, i32) {
    %c0_i32 = arith.constant 0 : i32
    %c0_i32_0 = arith.constant 0 : i32
    %c0_i32_1 = arith.constant 0 : i32
    return %c0_i32, %c0_i32_0 : i32, i32
  }
  func.func @transform_3(%arg0: i32) -> (i32, i32) {
    %c0_i32 = arith.constant 0 : i32
    %c0_i32_0 = arith.constant 0 : i32
    %c0_i32_1 = arith.constant 0 : i32
    return %c0_i32, %c0_i32_0 : i32, i32
  }
}

</mosaic_0001>

<bundles_post_ra>
// kernel: tpu_custom_call.1
= control target key start
LH: loop header
LB: loop body
LE: loop exit
PB: predicated region body
PF: predicated region fallthrough
CT: control target
= control target key end

     0   :  { %9 = vsyncpa [#allocation3], 0  ;;  %s903_s0 = inlined_call_operand.vmem [shape: f32[512,8], index: 0, kind: input, shape index: {}]   ;;  %s904_s1 = inlined_call_operand.vmem [shape: f32[8,128], index: 1, kind: input, shape index: {}]   ;;  %s905_s2 = inlined_call_operand.hbm [shape: f32[1,128], index: 2, kind: output, shape index: {0}]   ;;  %s906_s3 = inlined_call_operand.hbm [shape: f32[1,128], index: 3, kind: output, shape index: {1}]  }
   0x1   :  { %10 = vsyncpa [#allocation5], 0  ;;  %s757_s12 = smov 0  }
   0x2 LB: > { %s763_s13 = sadd.s32 4294967295, %s732_s12   ;;  %p594_p0 = scmp.ge.s32.totalorder %s732_s12, 1  ;;  %s732_s12 = sphi %s757_s12, %s16_s12  }
   0x3   : > { %p133_p1 = scmp.lt.s32.totalorder %s732_s12, 3 }
   0x5   : > { %p134_p2 = pnand %p594_p0, %p133_p1 }
   0x6   : > { %s595_s14 = sshll.u32 (!%p134_p2), %s763_s13, 5  ;;  %p597_p4 = scmp.ne.s32.totalorder (!%p134_p2), %s763_s13, 0 }
   0x7   : > { %137 = sbr.rel (%p134_p2) target bundleno = 276 (0x114), region = 28  ;;  %p153_p3 = scmp.lt.s32.totalorder (!%p134_p2), %s595_s14, 63 }
   0xc   : > { %s908_s14 = smov (!%p153_p3, %s595_s14), 63  ;;  %161 = sbr.rel (%p597_p4) target bundleno = 20 (0x14), region = 32 }
   0xd   : > { %s596_s15 = sshll.u32 %s908_s14, 3 }
   0xe   : > { %s771_s18 = scalar_lea.vmem %s903_s0, %s596_s15 }
  0x11   : > { %v734_v0 = vmov 0.0  }
  0x12   : > { %162 = vst [vmem:[#allocation2] sm:$0x1] %v734_v0 }
  0x13   : > { %163 = vst [vmem:[#allocation4] sm:$0x1] %v734_v0 }
  0x14 PF: > { %v196_v1 = vld [vmem:[%s904_s1] sm:$0xff]  ;;  %vm197_vm0 = vcmask 64512   ;;  %v165_v5 = vld [vmem:[%s771_s18 + $0x8] sm:$0xff]  ;;  %v166_v9 = vld [vmem:[%s771_s18 + $0x10] sm:$0xff]  ;;  %s735_s21 = smov [#allocation2]   ;;  %s527_s25 = sshll.u32 %s905_s2, 4  ;;  %s528_s25 = int_to_ptr.hbm [resolvable:$true] %s527_s25 }
  0x15   : > { %v164_v2 = vld [vmem:[%s771_s18] sm:$0xff]  ;;  %309 = vmatpush.msra.mxu0 %v196_v1  ;;  %636 = vmatpush.msra.mxu1 %v196_v1  ;;  %v173_v6 = vld [vmem:[%s771_s18 + $0x48] sm:$0xff]  ;;  %v174_v10 = vld [vmem:[%s771_s18 + $0x50] sm:$0xff]  ;;  %s525_s22 = sshll.u32 %s735_s21, 4  ;;  %p647_p5 = scmp.eq.s32.totalorder %s763_s13, 1  ;;  %s526_s22 = int_to_ptr.vmem [resolvable:$true] %s525_s22 }
  0x16   : > { %v172_v3 = vld [vmem:[%s771_s18 + $0x40] sm:$0xff]  ;;  %598 = vmatmul.msk.f32.vlgmr.msra.gmra.mxu0 %vm197_vm0, %v164_v2  ;;  %637 = vmatpush.msra.mxu2 %v196_v1  ;;  %v181_v7 = vld [vmem:[%s771_s18 + $0x88] sm:$0xff]  ;;  %v182_v11 = vld [vmem:[%s771_s18 + $0x90] sm:$0xff]  ;;  %s736_s26 = smov [#allocation4]   ;;  %s539_s30 = sshll.u32 %s906_s3, 4  ;;  %s540_s30 = int_to_ptr.hbm [resolvable:$true] %s539_s30 }
  0x17   : > { %606 = vmatmul.msk.f32.vlgmr.msra.gmra.mxu1 %vm197_vm0, %v172_v3  ;;  %v180_v4 = vld [vmem:[%s771_s18 + $0x80] sm:$0xff]  ;;  %638 = vmatpush.msra.mxu3 %v196_v1  ;;  %v189_v12 = vld [vmem:[%s771_s18 + $0xc8] sm:$0xff]  ;;  %v167_v13 = vld [vmem:[%s771_s18 + $0x18] sm:$0xff]  ;;  %s537_s27 = sshll.u32 %s736_s26, 4  ;;  %s538_s27 = int_to_ptr.vmem [resolvable:$true] %s537_s27 }
  0x18   : > { %614 = vmatmul.msk.f32.vlgmr.msra.gmra.mxu2 %vm197_vm0, %v180_v4  ;;  %v188_v8 = vld [vmem:[%s771_s18 + $0xc0] sm:$0xff]  ;;  %v175_v14 = vld [vmem:[%s771_s18 + $0x58] sm:$0xff]  ;;  %v190_v16 = vld [vmem:[%s771_s18 + $0xd0] sm:$0xff] }
  0x19   : > { %622 = vmatmul.msk.f32.vlgmr.msra.gmra.mxu3 %vm197_vm0, %v188_v8  ;;  %v183_v15 = vld [vmem:[%s771_s18 + $0x98] sm:$0xff]  ;;  %v168_v17 = vld [vmem:[%s771_s18 + $0x20] sm:$0xff]  ;;  %v169_v21 = vld [vmem:[%s771_s18 + $0x28] sm:$0xff] }
  0x1a   : > { %v176_v18 = vld [vmem:[%s771_s18 + $0x60] sm:$0xff]  ;;  %v191_v19 = vld [vmem:[%s771_s18 + $0xd8] sm:$0xff]  ;;  %v177_v22 = vld [vmem:[%s771_s18 + $0x68] sm:$0xff] }
  0x1b   : > { %v184_v20 = vld [vmem:[%s771_s18 + $0xa0] sm:$0xff]  ;;  %v185_v24 = vld [vmem:[%s771_s18 + $0xa8] sm:$0xff]  ;;  %v170_v25 = vld [vmem:[%s771_s18 + $0x30] sm:$0xff] }
  0x1c   : > { %v192_v23 = vld [vmem:[%s771_s18 + $0xe0] sm:$0xff]  ;;  %v178_v26 = vld [vmem:[%s771_s18 + $0x70] sm:$0xff]  ;;  %v193_v27 = vld [vmem:[%s771_s18 + $0xe8] sm:$0xff] }
  0x1d   : > { %v186_v28 = vld [vmem:[%s771_s18 + $0xb0] sm:$0xff]  ;;  %v171_v29 = vld [vmem:[%s771_s18 + $0x38] sm:$0xff] }
  0x1e   : > { %599 = vmatmul.msk.f32.gmra.mxu0 %vm197_vm0, %v165_v5  ;;  %v179_v30 = vld [vmem:[%s771_s18 + $0x78] sm:$0xff]  ;;  %v194_v31 = vld [vmem:[%s771_s18 + $0xf0] sm:$0xff] }
  0x1f   : > { %607 = vmatmul.msk.f32.gmra.mxu1 %vm197_vm0, %v173_v6  ;;  %v187_v32 = vld [vmem:[%s771_s18 + $0xb8] sm:$0xff] }
  0x20   : > { %615 = vmatmul.msk.f32.gmra.mxu2 %vm197_vm0, %v181_v7  ;;  %v195_v33 = vld [vmem:[%s771_s18 + $0xf8] sm:$0xff] }
  0x21   : > { %623 = vmatmul.msk.f32.gmra.mxu3 %vm197_vm0, %v189_v12 }
  0x26   : > { %600 = vmatmul.msk.f32.gmra.mxu0 %vm197_vm0, %v166_v9 }
  0x27   : > { %608 = vmatmul.msk.f32.gmra.mxu1 %vm197_vm0, %v174_v10 }
  0x28   : > { %616 = vmatmul.msk.f32.gmra.mxu2 %vm197_vm0, %v182_v11 }
  0x29   : > { %624 = vmatmul.msk.f32.gmra.mxu3 %vm197_vm0, %v190_v16 }
  0x2e   : > { %601 = vmatmul.msk.f32.gmra.mxu0 %vm197_vm0, %v167_v13 }
  0x2f   : > { %609 = vmatmul.msk.f32.gmra.mxu1 %vm197_vm0, %v175_v14 }
  0x30   : > { %617 = vmatmul.msk.f32.gmra.mxu2 %vm197_vm0, %v183_v15 }
  0x31   : > { %625 = vmatmul.msk.f32.gmra.mxu3 %vm197_vm0, %v191_v19 }
  0x36   : > { %602 = vmatmul.msk.f32.gmra.mxu0 %vm197_vm0, %v168_v17 }
  0x37   : > { %610 = vmatmul.msk.f32.gmra.mxu1 %vm197_vm0, %v176_v18 }
  0x38   : > { %618 = vmatmul.msk.f32.gmra.mxu2 %vm197_vm0, %v184_v20 }
  0x39   : > { %626 = vmatmul.msk.f32.gmra.mxu3 %vm197_vm0, %v192_v23 }
  0x3e   : > { %603 = vmatmul.msk.f32.gmra.mxu0 %vm197_vm0, %v169_v21 }
  0x3f   : > { %611 = vmatmul.msk.f32.gmra.mxu1 %vm197_vm0, %v177_v22 }
  0x40   : > { %619 = vmatmul.msk.f32.gmra.mxu2 %vm197_vm0, %v185_v24 }
  0x41   : > { %627 = vmatmul.msk.f32.gmra.mxu3 %vm197_vm0, %v193_v27 }
  0x46   : > { %604 = vmatmul.msk.f32.gmra.mxu0 %vm197_vm0, %v170_v25 }
  0x47   : > { %612 = vmatmul.msk.f32.gmra.mxu1 %vm197_vm0, %v178_v26 }
  0x48   : > { %620 = vmatmul.msk.f32.gmra.mxu2 %vm197_vm0, %v186_v28 }
  0x49   : > { %628 = vmatmul.msk.f32.gmra.mxu3 %vm197_vm0, %v194_v31 }
  0x4e   : > { %605 = vmatmul.msk.f32.gmra.mxu0 %vm197_vm0, %v171_v29 }
  0x4f   : > { %613 = vmatmul.msk.f32.gmra.mxu1 %vm197_vm0, %v179_v30 }
  0x50   : > { %621 = vmatmul.msk.f32.gmra.mxu2 %vm197_vm0, %v187_v32 }
  0x51   : > { %629 = vmatmul.msk.f32.gmra.mxu3 %vm197_vm0, %v195_v33 }
  0x93   : > { %v311_v34 = vpop.f32.mrf.mxu0 }
  0x94   : > { %v335_v35 = vpop.f32.mrf.mxu1  ;;  %v448_v52 = vmul.f32 %v311_v34, %v311_v34 }
  0x95   : > { %v456_v14 = vmul.f32 %v335_v35, %v335_v35 }
  0x9b   : > { %v314_v36 = vpop.f32.mrf.mxu0  ;;  %v841_v38 = vpop.f32.mrf.mxu2 }
  0x9c   : > { %v338_v37 = vpop.f32.mrf.mxu1  ;;  %v845_v44 = vpop.f32.mrf.mxu3  ;;  %v449_v50 = vmul.f32 %v314_v36, %v314_v36  ;;  %v408_v53 = vadd.f32 %v314_v36, %v311_v34 }
  0x9d   : > { %v457_v18 = vmul.f32 %v338_v37, %v338_v37 }
  0x9e   : > { %v480_v55 = vadd.f32 %v449_v50, %v448_v52  ;;  %v464_v50 = vmul.f32 %v841_v38, %v841_v38 }
  0xa3   : > { %v317_v39 = vpop.f32.mrf.mxu0  ;;  %v843_v42 = vpop.f32.mrf.mxu2 }
  0xa4   : > { %v341_v40 = vpop.f32.mrf.mxu1  ;;  %v849_v49 = vpop.f32.mrf.mxu3  ;;  %v450_v54 = vmul.f32 %v317_v39, %v317_v39  ;;  %v409_v56 = vadd.f32 %v408_v53, %v317_v39 }
  0xa5   : > { %v458_v21 = vmul.f32 %v341_v40, %v341_v40 }
  0xa6   : > { %v481_v60 = vadd.f32 %v480_v55, %v450_v54 }
  0xab   : > { %v320_v41 = vpop.f32.mrf.mxu0  ;;  %v847_v46 = vpop.f32.mrf.mxu2 }
  0xac   : > { %v344_v43 = vpop.f32.mrf.mxu1  ;;  %v451_v57 = vmul.f32 %v320_v41, %v320_v41  ;;  %v410_v61 = vadd.f32 %v409_v56, %v320_v41  ;;  %v853_v63 = vpop.f32.mrf.mxu3  ;;  %v466_v55 = vmul.f32 %v847_v46, %v847_v46 }
  0xad   : > { %v459_v25 = vmul.f32 %v344_v43, %v344_v43 }
  0xae   : > { %v482_v0 = vadd.f32 %v481_v60, %v451_v57 }
  0xb3   : > { %v323_v45 = vpop.f32.mrf.mxu0  ;;  %v851_v51 = vpop.f32.mrf.mxu2 }
  0xb4   : > { %v347_v47 = vpop.f32.mrf.mxu1  ;;  %v452_v62 = vmul.f32 %v323_v45, %v323_v45  ;;  %v411_v1 = vadd.f32 %v410_v61, %v323_v45  ;;  %v855_v17 = vpop.f32.mrf.mxu3 }
  0xb5   : > { %v460_v28 = vmul.f32 %v347_v47, %v347_v47 }
  0xb6   : > { %v483_v3 = vadd.f32 %v482_v0, %v452_v62 }
  0xbb   : > { %v326_v48 = vpop.f32.mrf.mxu0  ;;  %v371_v6 = vpop.f32.mrf.mxu2 }
  0xbc   : > { %v350_v59 = vpop.f32.mrf.mxu1  ;;  %v453_v2 = vmul.f32 %v326_v48, %v326_v48  ;;  %v412_v4 = vadd.f32 %v411_v1, %v326_v48  ;;  %v468_v61 = vmul.f32 %v371_v6, %v371_v6 }
  0xbd   : > { %v461_v33 = vmul.f32 %v350_v59, %v350_v59 }
  0xbe   : > { %v484_v7 = vadd.f32 %v483_v3, %v453_v2 }
  0xc3   : > { %v329_v58 = vpop.f32.mrf.mxu0  ;;  %v374_v24 = vpop.f32.mrf.mxu2 }
  0xc4   : > { %v454_v5 = vmul.f32 %v329_v58, %v329_v58  ;;  %v413_v8 = vadd.f32 %v412_v4, %v329_v58  ;;  %v353_v13 = vpop.f32.mrf.mxu1 }
  0xc5   : > { %v462_v41 = vmul.f32 %v353_v13, %v353_v13 }
  0xc6   : > { %v485_v10 = vadd.f32 %v484_v7, %v454_v5 }
  0xcb   : > { %v332_v9 = vpop.f32.mrf.mxu0 }
  0xcc   : > { %v414_v11 = vadd.f32 %v413_v8, %v332_v9  ;;  %v455_v12 = vmul.f32 %v332_v9, %v332_v9  ;;  %v356_v31 = vpop.f32.mrf.mxu1 }
  0xce   : > { %v415_v15 = vadd.f32 %v414_v11, %v335_v35  ;;  %v486_v16 = vadd.f32 %v485_v10, %v455_v12  ;;  %v395_v35 = vpop.f32.mrf.mxu3  ;;  %v472_v11 = vmul.f32 %v845_v44, %v845_v44 }
  0xd0   : > { %v416_v19 = vadd.f32 %v415_v15, %v338_v37  ;;  %v487_v20 = vadd.f32 %v486_v16, %v456_v14  ;;  %v463_v37 = vmul.f32 %v356_v31, %v356_v31  ;;  %v474_v15 = vmul.f32 %v853_v63, %v853_v63 }
  0xd2   : > { %v417_v22 = vadd.f32 %v416_v19, %v341_v40  ;;  %v488_v23 = vadd.f32 %v487_v20, %v457_v18  ;;  %v377_v40 = vpop.f32.mrf.mxu2  ;;  %v475_v19 = vmul.f32 %v855_v17, %v855_v17 }
  0xd3   : > { %v470_v7 = vmul.f32 %v377_v40, %v377_v40 }
  0xd4   : > { %v489_v26 = vadd.f32 %v488_v23, %v458_v21  ;;  %v418_v27 = vadd.f32 %v417_v22, %v344_v43 }
  0xd6   : > { %v419_v29 = vadd.f32 %v418_v27, %v347_v47  ;;  %v490_v30 = vadd.f32 %v489_v26, %v459_v25  ;;  %v465_v47 = vmul.f32 %v843_v42, %v843_v42  ;;  %v398_v58 = vpop.f32.mrf.mxu3 }
  0xd7   : > { %v477_v26 = vmul.f32 %v398_v58, %v398_v58 }
  0xd8   : > { %v420_v32 = vadd.f32 %v419_v29, %v350_v59  ;;  %v491_v34 = vadd.f32 %v490_v30, %v460_v28  ;;  %v467_v59 = vmul.f32 %v851_v51, %v851_v51 }
  0xda   : > { %v492_v36 = vadd.f32 %v491_v34, %v461_v33  ;;  %v421_v39 = vadd.f32 %v420_v32, %v353_v13  ;;  %v380_v1 = vpop.f32.mrf.mxu2 }
  0xdb   : > { %v471_v8 = vmul.f32 %v380_v1, %v380_v1 }
  0xdc   : > { %v493_v45 = vadd.f32 %v492_v36, %v462_v41  ;;  %v422_v48 = vadd.f32 %v421_v39, %v356_v31 }
  0xde   : > { %v423_v43 = vadd.f32 %v422_v48, %v841_v38  ;;  %v494_v52 = vadd.f32 %v493_v45, %v463_v37  ;;  %v401_v10 = vpop.f32.mrf.mxu3  ;;  %v407_v48 = vld [vmem:[#allocation2] sm:$0x1] }
  0xdf   : > { %v478_v29 = vmul.f32 %v401_v10, %v401_v10 }
  0xe0   : > { %v424_v53 = vadd.f32 %v423_v43, %v843_v42  ;;  %v495_v54 = vadd.f32 %v494_v52, %v464_v50  ;;  %v469_v42 = vmul.f32 %v374_v24, %v374_v24  ;;  %v447_v43 = vld [vmem:[#allocation4] sm:$0x1] }
  0xe2   : > { %v425_v56 = vadd.f32 %v424_v53, %v847_v46  ;;  %v496_v57 = vadd.f32 %v495_v54, %v465_v47 }
  0xe4   : > { %v497_v60 = vadd.f32 %v496_v57, %v466_v55  ;;  %v426_v38 = vadd.f32 %v425_v56, %v851_v51 }
  0xe6   : > { %v427_v62 = vadd.f32 %v426_v38, %v371_v6  ;;  %v498_v0 = vadd.f32 %v497_v60, %v467_v59  ;;  %v473_v6 = vmul.f32 %v849_v49, %v849_v49 }
  0xe8   : > { %v428_v2 = vadd.f32 %v427_v62, %v374_v24  ;;  %v499_v3 = vadd.f32 %v498_v0, %v468_v61  ;;  %v404_v24 = vpop.f32.mrf.mxu3 }
  0xe9   : > { %v479_v30 = vmul.f32 %v404_v24, %v404_v24 }
  0xea   : > { %v500_v4 = vadd.f32 %v499_v3, %v469_v42  ;;  %v429_v5 = vadd.f32 %v428_v2, %v377_v40 }
  0xec   : > { %v501_v46 = vadd.f32 %v500_v4, %v470_v7  ;;  %v430_v9 = vadd.f32 %v429_v5, %v380_v1 }
  0xee   : > { %v431_v12 = vadd.f32 %v430_v9, %v845_v44  ;;  %v502_v51 = vadd.f32 %v501_v46, %v471_v8  ;;  %v476_v44 = vmul.f32 %v395_v35, %v395_v35 }
  0xf0   : > { %v432_v13 = vadd.f32 %v431_v12, %v849_v49  ;;  %v503_v14 = vadd.f32 %v502_v51, %v472_v11 }
  0xf2   : > { %v433_v16 = vadd.f32 %v432_v13, %v853_v63  ;;  %v504_v18 = vadd.f32 %v503_v14, %v473_v6 }
  0xf4   : > { %v505_v20 = vadd.f32 %v504_v18, %v474_v15  ;;  %v434_v21 = vadd.f32 %v433_v16, %v855_v17 }
  0xf6   : > { %v435_v22 = vadd.f32 %v434_v21, %v395_v35  ;;  %v506_v23 = vadd.f32 %v505_v20, %v475_v19 }
  0xf8   : > { %v436_v25 = vadd.f32 %v435_v22, %v398_v58  ;;  %v507_v49 = vadd.f32 %v506_v23, %v476_v44 }
  0xfa   : > { %v508_v27 = vadd.f32 %v507_v49, %v477_v26  ;;  %v437_v28 = vadd.f32 %v436_v25, %v401_v10 }
  0xfc   : > { %v509_v31 = vadd.f32 %v508_v27, %v478_v29  ;;  %v438_v63 = vadd.f32 %v437_v28, %v404_v24 }
  0xfe   : > { %v439_v32 = vrot.slane %v438_v63, 4  ;;  %v510_v33 = vadd.f32 %v509_v31, %v479_v30 }
 0x100   : > { %v440_v34 = vadd.f32 %v439_v32, %v438_v63  ;;  %v511_v36 = vrot.slane %v510_v33, 4 }
 0x102   : > { %v441_v39 = vrot.slane %v440_v34, 2  ;;  %v512_v17 = vadd.f32 %v511_v36, %v510_v33 }
 0x104   : > { %v442_v41 = vadd.f32 %v441_v39, %v440_v34  ;;  %v513_v35 = vrot.slane %v512_v17, 2 }
 0x106   : > { %v443_v37 = vrot.slane %v442_v41, 1  ;;  %v514_v45 = vadd.f32 %v513_v35, %v512_v17 }
 0x108   : > { %v444_v40 = vadd.f32 %v443_v37, %v442_v41  ;;  %v515_v50 = vrot.slane %v514_v45, 1 }
 0x10a   : > { %v445_v52 = vadd.f32 %v444_v40, %v407_v48  ;;  %v516_v47 = vadd.f32 %v515_v50, %v514_v45 }
 0x10c   : > { %446 = vst [vmem:[#allocation2] sm:$0x1] %v445_v52  ;;  %v517_v53 = vadd.f32 %v516_v47, %v447_v43 }
 0x10d   : > { %640 = dma.vmem_to_hbm [thread:$0]  (%p647_p5), %s526_s22, 16, %s528_s25, [#allocation3]  }
 0x10e   : > { %518 = vst [vmem:[#allocation4] sm:$0x1] %v517_v53 }
 0x10f   : > { %642 = dma.vmem_to_hbm [thread:$0]  (%p647_p5), %s538_s27, 16, %s540_s30, [#allocation5]  }
 0x110   : > { %723 = dma.done.wait (%p647_p5), [#allocation3], 16  }
 0x111   : > { %725 = vsyncadd (%p647_p5), [#allocation3], 4294967280 }
 0x112   : > { %727 = dma.done.wait (%p647_p5), [#allocation5], 16  }
 0x113   : > { %729 = vsyncadd (%p647_p5), [#allocation5], 4294967280 }
 0x114 PF: > { %s16_s12 = sadd.s32 1, %s732_s12  }
 0x115   : > { %p13_p6 = scmp.ge.s32.totalorder %s16_s12, 4  }
 0x117   :  { %15 = sbr.rel (!%p13_p6) target bundleno = 2 (0x2), region = 67 }
 0x11c   :  { %558 = vsyncpa [#allocation3], 1 }
 0x11d   :  { %560 = vsyncpa [#allocation3 + $0x1], 1 }
 0x11e   :  { %561 = vsyncpa [#allocation5], 1 }

</bundles_post_ra>
